<compile_context>
chip_gen: v6e
topology: v6e:2x2x1
jax: 0.10.0
libtpu: 0.0.40
codegen_flags: <defaults>
</compile_context>

<pallas_src>
import jax
import jax.numpy as jnp
from jax.experimental import pallas as pl
from jax.experimental.pallas import tpu as pltpu


IN_DIM = 28 * 28          # 784 (== full last dim of x, so no lane padding needed)
HID_DIM = 64
OUT_PAD = 128             # lane-dense fused head output: [mu | logvar | pad]


def encoder_kernel(x_ref, w1_ref, b1_ref, wh_ref, bh_ref, out_ref):
    # x tile is read from HBM as f32 (its native dtype); cast to bf16 only for
    # the MXU operands.  f32 accumulate, f32 VPU epilogue (bias + ReLU).
    x = x_ref[...].astype(jnp.bfloat16)
    h = jnp.dot(x, w1_ref[...], preferred_element_type=jnp.float32)
    h = jnp.maximum(h + b1_ref[...], 0.0)
    # fused heads: [mu | logvar | 0] = h @ [Wmu | Wlv | 0] + [bmu | blv | 0]
    out = jnp.dot(h.astype(jnp.bfloat16), wh_ref[...],
                  preferred_element_type=jnp.float32) + bh_ref[...]
    out_ref[...] = out.astype(out_ref.dtype)


def _round_up(n, m):
    return ((n + m - 1) // m) * m


def encoder_forward(x, w1, b1, wmu, bmu, wlv, blv, *, block_b=512):
    """x: (B, 784) f32. Weights in (in, out) layout. Returns (mu, logvar) f32."""
    B, in_dim = x.shape
    assert in_dim == IN_DIM, f"expected x last dim {IN_DIM}, got {in_dim}"
    latent_dim = wmu.shape[1]
    assert 2 * latent_dim <= OUT_PAD, (
        "fused mu/logvar head packing requires 2*latent_dim <= 128")

    # ---- tiny wrapper-side weight plumbing (weights are resident in VMEM) ----
    w1_b = w1.astype(jnp.bfloat16)                              # (784, 64)
    wh = jnp.zeros((HID_DIM, OUT_PAD), jnp.bfloat16)            # [Wmu | Wlv | 0]
    wh = wh.at[:, :latent_dim].set(wmu.astype(jnp.bfloat16))
    wh = wh.at[:, latent_dim:2 * latent_dim].set(wlv.astype(jnp.bfloat16))
    bh = jnp.zeros((1, OUT_PAD), jnp.float32)                   # [bmu | blv | 0]
    bh = bh.at[:, :latent_dim].set(bmu.reshape(1, -1).astype(jnp.float32))
    bh = bh.at[:, latent_dim:2 * latent_dim].set(blv.reshape(1, -1).astype(jnp.float32))
    b1_f = b1.reshape(1, -1).astype(jnp.float32)                # (1, 64)

    # ---- batch tiling: no padding / copying of x; partial last tile is fine ----
    if B > block_b:
        tb = block_b                              # multiple of 8 by construction
    elif B >= 128:
        tb = _round_up(pl.cdiv(B, 2), 8)          # >= 2 tiles -> both TCs on v7x
    else:
        tb = B                                    # single full-batch tile
    grid = pl.cdiv(B, tb)

    out = pl.pallas_call(
        encoder_kernel,
        out_shape=jax.ShapeDtypeStruct((B, OUT_PAD), jnp.float32),
        grid_spec=pl.GridSpec(
            grid=(grid,),
            in_specs=[
                pl.BlockSpec((tb, IN_DIM), lambda i: (i, 0)),        # x tile (f32)
                pl.BlockSpec((IN_DIM, HID_DIM), lambda i: (0, 0)),   # W1 (resident)
                pl.BlockSpec((1, HID_DIM), lambda i: (0, 0)),        # b1
                pl.BlockSpec((HID_DIM, OUT_PAD), lambda i: (0, 0)),  # fused head W
                pl.BlockSpec((1, OUT_PAD), lambda i: (0, 0)),        # fused head b
            ],
            out_specs=pl.BlockSpec((tb, OUT_PAD), lambda i: (i, 0)),
        ),
        compiler_params=pltpu.CompilerParams(
            dimension_semantics=("parallel",),   # batch tiles -> both TCs on v7x
        ),
    )(x, w1_b, b1_f, wh, bh)

    # NOTE: rows past B in a partial last tile (and lanes past 2*latent_dim)
    # contain padding garbage and must not be reduced over; slice them off here.
    mu = out[:B, :latent_dim]
    logvar = out[:B, latent_dim:2 * latent_dim]
    return mu, logvar


def init_params(key, latent_dim):
    """Deterministic init mimicking nn.Linear's uniform(-1/sqrt(fan_in), 1/sqrt(fan_in))."""
    ks = jax.random.split(key, 6)

    def linear(kw, kb, fan_in, fan_out):
        bound = 1.0 / jnp.sqrt(jnp.float32(fan_in))
        w = jax.random.uniform(kw, (fan_in, fan_out), jnp.float32, -bound, bound)
        b = jax.random.uniform(kb, (1, fan_out), jnp.float32, -bound, bound)
        return w, b

    w1, b1 = linear(ks[0], ks[1], IN_DIM, HID_DIM)
    wmu, bmu = linear(ks[2], ks[3], HID_DIM, latent_dim)
    wlv, blv = linear(ks[4], ks[5], HID_DIM, latent_dim)
    return w1, b1, wmu, bmu, wlv, blv


if __name__ == "__main__":
    key = jax.random.PRNGKey(0)
    k_x, k_p = jax.random.split(key)

    B = 8
    latent_dim = 16

    x = jax.random.normal(k_x, (B, IN_DIM), jnp.float32)
    w1, b1, wmu, bmu, wlv, blv = init_params(k_p, latent_dim)

    mu, logvar = encoder_forward(x, w1, b1, wmu, bmu, wlv, blv)
    jax.block_until_ready((mu, logvar))

    # Reference in plain JAX with the same bf16 operand rounding / f32 accumulate.
    def rt(a):  # round-trip through bf16 (operand precision used by the kernel)
        return a.astype(jnp.bfloat16).astype(jnp.float32)

    h_ref = jnp.maximum(rt(x) @ rt(w1) + b1, 0.0)
    mu_ref = rt(h_ref) @ rt(wmu) + bmu
    lv_ref = rt(h_ref) @ rt(wlv) + blv

    assert mu.shape == (B, latent_dim) and logvar.shape == (B, latent_dim)
    assert jnp.allclose(mu, mu_ref, atol=5e-3, rtol=5e-3)
    assert jnp.allclose(logvar, lv_ref, atol=5e-3, rtol=5e-3)

    # Sanity check against the full-f32 PyTorch math (loose tol: bf16 operand rounding).
    h32 = jnp.maximum(x @ w1 + b1, 0.0)
    assert jnp.allclose(mu, h32 @ wmu + bmu, atol=5e-2, rtol=5e-2)
    assert jnp.allclose(logvar, h32 @ wlv + blv, atol=5e-2, rtol=5e-2)

    print("KERNEL_OK")
</pallas_src>

<mosaic_0001>
module attributes {stable_mosaic.version = 11 : i64} {
  func.func @encoder_kernel(%arg0: i32, %arg1: memref<8x784xf32, #tpu.memory_space<vmem>>, %arg2: memref<784x64xbf16, #tpu.memory_space<vmem>>, %arg3: memref<1x64xf32, #tpu.memory_space<vmem>>, %arg4: memref<64x128xbf16, #tpu.memory_space<vmem>>, %arg5: memref<1x128xf32, #tpu.memory_space<vmem>>, %arg6: memref<8x128xf32, #tpu.memory_space<vmem>>) attributes {dimension_semantics = [#tpu.dimension_semantics<parallel>], iteration_bounds = array<i64: 1>, scalar_prefetch = 0 : i64, scratch_operands = 0 : i64, tpu.core_type = #tpu.core_type<tc>, window_params = [{transform_indices = @transform_0, window_bounds = array<i64: 8, 784>}, {pipeline_mode = #tpu.pipeline_mode<synchronous>, transform_indices = @transform_1, window_bounds = array<i64: 784, 64>}, {pipeline_mode = #tpu.pipeline_mode<synchronous>, transform_indices = @transform_2, window_bounds = array<i64: 1, 64>}, {pipeline_mode = #tpu.pipeline_mode<synchronous>, transform_indices = @transform_3, window_bounds = array<i64: 64, 128>}, {pipeline_mode = #tpu.pipeline_mode<synchronous>, transform_indices = @transform_4, window_bounds = array<i64: 1, 128>}, {transform_indices = @transform_5, window_bounds = array<i64: 8, 128>}]} {
    %c0 = arith.constant 0 : index
    %c0_0 = arith.constant 0 : index
    %0 = vector.load %arg1[%c0, %c0_0] : memref<8x784xf32, #tpu.memory_space<vmem>>, vector<8x784xf32>
    %1 = arith.truncf %0 : vector<8x784xf32> to vector<8x784xbf16>
    %c0_1 = arith.constant 0 : index
    %c0_2 = arith.constant 0 : index
    %2 = vector.load %arg2[%c0_1, %c0_2] : memref<784x64xbf16, #tpu.memory_space<vmem>>, vector<784x64xbf16>
    %cst = arith.constant dense<0.000000e+00> : vector<8x64xf32>
    %3 = tpu.matmul %1, %2, %cst {dimension_numbers = #tpu.dot_dimension_numbers<[1], [0], [0], [1], [0, 0, 1, 1], [], []>} : vector<8x784xbf16>, vector<784x64xbf16>, vector<8x64xf32> -> vector<8x64xf32>
    %c0_3 = arith.constant 0 : index
    %c0_4 = arith.constant 0 : index
    %4 = vector.load %arg3[%c0_3, %c0_4] : memref<1x64xf32, #tpu.memory_space<vmem>>, vector<1x64xf32>
    %5 = vector.broadcast %4 : vector<1x64xf32> to vector<8x64xf32>
    %6 = arith.addf %3, %5 : vector<8x64xf32>
    %cst_5 = arith.constant 0.000000e+00 : f32
    %7 = vector.broadcast %cst_5 : f32 to vector<8x64xf32>
    %8 = arith.maximumf %6, %7 : vector<8x64xf32>
    %9 = arith.truncf %8 : vector<8x64xf32> to vector<8x64xbf16>
    %c0_6 = arith.constant 0 : index
    %c0_7 = arith.constant 0 : index
    %10 = vector.load %arg4[%c0_6, %c0_7] : memref<64x128xbf16, #tpu.memory_space<vmem>>, vector<64x128xbf16>
    %cst_8 = arith.constant dense<0.000000e+00> : vector<8x128xf32>
    %11 = tpu.matmul %9, %10, %cst_8 {dimension_numbers = #tpu.dot_dimension_numbers<[1], [0], [0], [1], [0, 0, 1, 1], [], []>} : vector<8x64xbf16>, vector<64x128xbf16>, vector<8x128xf32> -> vector<8x128xf32>
    %c0_9 = arith.constant 0 : index
    %c0_10 = arith.constant 0 : index
    %12 = vector.load %arg5[%c0_9, %c0_10] : memref<1x128xf32, #tpu.memory_space<vmem>>, vector<1x128xf32>
    %13 = vector.broadcast %12 : vector<1x128xf32> to vector<8x128xf32>
    %14 = arith.addf %11, %13 : vector<8x128xf32>
    %c0_11 = arith.constant 0 : index
    %c0_12 = arith.constant 0 : index
    %15 = vector.load %arg6[%c0_11, %c0_12] : memref<8x128xf32, #tpu.memory_space<vmem>>, vector<8x128xf32>
    tpu.vector_store %arg6[%c0_11, %c0_12], %14 {strides = array<i32>} : memref<8x128xf32, #tpu.memory_space<vmem>>, vector<8x128xf32>,
    return
  }
  func.func @transform_0(%arg0: i32) -> (i32, i32) {
    %c0_i32 = arith.constant 0 : i32
    %c0_i32_0 = arith.constant 0 : i32
    return %arg0, %c0_i32 : i32, i32
  }
  func.func @transform_1(%arg0: i32) -> (i32, i32) {
    %c0_i32 = arith.constant 0 : i32
    %c0_i32_0 = arith.constant 0 : i32
    %c0_i32_1 = arith.constant 0 : i32
    return %c0_i32, %c0_i32_0 : i32, i32
  }
  func.func @transform_2(%arg0: i32) -> (i32, i32) {
    %c0_i32 = arith.constant 0 : i32
    %c0_i32_0 = arith.constant 0 : i32
    %c0_i32_1 = arith.constant 0 : i32
    return %c0_i32, %c0_i32_0 : i32, i32
  }
  func.func @transform_3(%arg0: i32) -> (i32, i32) {
    %c0_i32 = arith.constant 0 : i32
    %c0_i32_0 = arith.constant 0 : i32
    %c0_i32_1 = arith.constant 0 : i32
    return %c0_i32, %c0_i32_0 : i32, i32
  }
  func.func @transform_4(%arg0: i32) -> (i32, i32) {
    %c0_i32 = arith.constant 0 : i32
    %c0_i32_0 = arith.constant 0 : i32
    %c0_i32_1 = arith.constant 0 : i32
    return %c0_i32, %c0_i32_0 : i32, i32
  }
  func.func @transform_5(%arg0: i32) -> (i32, i32) {
    %c0_i32 = arith.constant 0 : i32
    %c0_i32_0 = arith.constant 0 : i32
    return %arg0, %c0_i32 : i32, i32
  }
}

</mosaic_0001>

<bundles_post_ra>
// kernel: tpu_custom_call.1
= control target key start
LH: loop header
LB: loop body
LE: loop exit
PB: predicated region body
PF: predicated region fallthrough
CT: control target
= control target key end

     0   :  { %v925_v44 = vmov 0.0   ;;  %vm926_vm0 = vmmov 0   ;;  %vm435_vm1 = vcmask 130048   ;;  %s1149_s0 = inlined_call_operand.vmem [shape: f32[8,784], index: 0, kind: input, shape index: {}]   ;;  %s1150_s1 = inlined_call_operand.vmem [shape: bf16[784,64], index: 1, kind: input, shape index: {}]   ;;  %s1151_s2 = inlined_call_operand.vmem [shape: f32[1,64], index: 2, kind: input, shape index: {}]   ;;  %s1152_s3 = inlined_call_operand.vmem [shape: bf16[64,128], index: 3, kind: input, shape index: {}]   ;;  %s1153_s4 = inlined_call_operand.vmem [shape: f32[1,128], index: 4, kind: input, shape index: {}]   ;;  %s1154_s5 = inlined_call_operand.hbm [shape: f32[8,128], index: 5, kind: output, shape index: {}]  }
   0x1   :  { %v850_v0 = vld [vmem:[%s1150_s1 + $0x78] sm:$0xff]   ;;  %v854_v4 = vld [vmem:[%s1150_s1 + $0x70] sm:$0xff]   ;;  %v858_v8 = vld [vmem:[%s1150_s1 + $0x68] sm:$0xff]  }
   0x2   :  { %v851_v1 = vld [vmem:[%s1150_s1 + $0x38] sm:$0xff]   ;;  %756 = vmatprep.subr.bf16.mxu0 %v850_v0  ;;  %v855_v5 = vld [vmem:[%s1150_s1 + $0x30] sm:$0xff]   ;;  %v859_v9 = vld [vmem:[%s1150_s1 + $0x28] sm:$0xff]  }
   0x3   :  { %v852_v2 = vld [vmem:[%s1150_s1 + $0xf8] sm:$0xff]   ;;  %757 = vmatpush3.bf16.msra.mxu0 %v851_v1  ;;  %v856_v6 = vld [vmem:[%s1150_s1 + $0xf0] sm:$0xff]   ;;  %v860_v10 = vld [vmem:[%s1150_s1 + $0xe8] sm:$0xff]  }
   0x4   :  { %v853_v3 = vld [vmem:[%s1150_s1 + $0xb8] sm:$0xff]   ;;  %778 = vmatprep.subr.bf16.mxu1 %v852_v2  ;;  %758 = vmatprep.subr.bf16.mxu0 %v854_v4  ;;  %v857_v7 = vld [vmem:[%s1150_s1 + $0xb0] sm:$0xff]   ;;  %v861_v11 = vld [vmem:[%s1150_s1 + $0xa8] sm:$0xff]  }
   0x5   :  { %779 = vmatpush3.bf16.msra.mxu1 %v853_v3  ;;  %v862_v12 = vld [vmem:[%s1150_s1 + $0x60] sm:$0xff]   ;;  %v866_v16 = vld [vmem:[%s1150_s1 + $0x58] sm:$0xff]   ;;  %v870_v20 = vld [vmem:[%s1150_s1 + $0x50] sm:$0xff]  }
   0x6   :  { %780 = vmatprep.subr.bf16.mxu1 %v856_v6  ;;  %v863_v13 = vld [vmem:[%s1150_s1 + $0x20] sm:$0xff]   ;;  %v867_v17 = vld [vmem:[%s1150_s1 + $0x18] sm:$0xff]   ;;  %v871_v21 = vld [vmem:[%s1150_s1 + $0x10] sm:$0xff]  }
   0x7   :  { %759 = vmatpush3.bf16.msra.mxu0 %v855_v5  ;;  %v864_v14 = vld [vmem:[%s1150_s1 + $0xe0] sm:$0xff]   ;;  %v868_v18 = vld [vmem:[%s1150_s1 + $0xd8] sm:$0xff]   ;;  %v872_v22 = vld [vmem:[%s1150_s1 + $0xd0] sm:$0xff]  }
   0x8   :  { %760 = vmatprep.subr.bf16.mxu0 %v858_v8  ;;  %v865_v15 = vld [vmem:[%s1150_s1 + $0xa0] sm:$0xff]   ;;  %v869_v19 = vld [vmem:[%s1150_s1 + $0x98] sm:$0xff]   ;;  %v873_v23 = vld [vmem:[%s1150_s1 + $0x90] sm:$0xff]  }
   0x9   :  { %781 = vmatpush3.bf16.msra.mxu1 %v857_v7  ;;  %v874_v24 = vld [vmem:[%s1150_s1 + $0x48] sm:$0xff]   ;;  %v878_v28 = vld [vmem:[%s1150_s1 + $0x40] sm:$0xff]   ;;  %v882_v36 = vld [vmem:[%s1150_s1 + $0x178] sm:$0xff]  }
   0xa   :  { %782 = vmatprep.subr.bf16.mxu1 %v860_v10  ;;  %v875_v25 = vld [vmem:[%s1150_s1 + $0x8] sm:$0xff]   ;;  %v879_v29 = vld [vmem:[%s1150_s1] sm:$0xff]   ;;  %v25_v37 = vld [vmem:[%s1149_s0 + $0x18] sm:$0xff] }
   0xb   :  { %761 = vmatpush3.bf16.msra.mxu0 %v859_v9  ;;  %v876_v26 = vld [vmem:[%s1150_s1 + $0xc8] sm:$0xff]   ;;  %v880_v30 = vld [vmem:[%s1150_s1 + $0xc0] sm:$0xff]   ;;  %v32_v38 = vpack.c.bf16 %v25_v37, %v25_v37  ;;  %v883_v39 = vld [vmem:[%s1150_s1 + $0x138] sm:$0xff]  }
   0xc   :  { %762 = vmatprep.subr.bf16.mxu0 %v862_v12  ;;  %v877_v27 = vld [vmem:[%s1150_s1 + $0x88] sm:$0xff]   ;;  %v881_v33 = vld [vmem:[%s1150_s1 + $0x80] sm:$0xff]   ;;  %v24_v40 = vld [vmem:[%s1149_s0 + $0x10] sm:$0xff] }
   0xd   :  { %783 = vmatpush3.bf16.msra.mxu1 %v861_v11  ;;  %v23_v31 = vld [vmem:[%s1149_s0 + $0x8] sm:$0xff]  ;;  %v22_v34 = vld [vmem:[%s1149_s0] sm:$0xff]  ;;  %511 = vmatprep.mubr.bf16.mxu1 %v32_v38  ;;  %v31_v41 = vpack.c.bf16 %v24_v40, %v24_v40  ;;  %v884_v42 = vld [vmem:[%s1150_s1 + $0x170] sm:$0xff]  }
   0xe   :  { %784 = vmatprep.subr.bf16.mxu1 %v864_v14  ;;  %v30_v32 = vpack.c.bf16 %v23_v31, %v23_v31  ;;  %v29_v35 = vpack.c.bf16 %v22_v34, %v22_v34  ;;  %v885_v43 = vld [vmem:[%s1150_s1 + $0x130] sm:$0xff]   ;;  %v886_v45 = vld [vmem:[%s1150_s1 + $0x168] sm:$0xff]   ;;  %v888_v47 = vld [vmem:[%s1150_s1 + $0x160] sm:$0xff]  }
   0xf   :  { %763 = vmatpush3.bf16.msra.mxu0 %v863_v13  ;;  %v887_v46 = vld [vmem:[%s1150_s1 + $0x128] sm:$0xff]   ;;  %v889_v48 = vld [vmem:[%s1150_s1 + $0x120] sm:$0xff]   ;;  %v890_v49 = vld [vmem:[%s1150_s1 + $0x158] sm:$0xff]  }
  0x10   :  { %764 = vmatprep.subr.bf16.mxu0 %v866_v16  ;;  %471 = vmatprep.mubr.bf16.mxu0 %v30_v32  ;;  %v891_v50 = vld [vmem:[%s1150_s1 + $0x118] sm:$0xff]   ;;  %v892_v51 = vld [vmem:[%s1150_s1 + $0x150] sm:$0xff]   ;;  %v898_v53 = vld [vmem:[%s1150_s1 + $0x180] sm:$0xff]  }
  0x11   :  { %785 = vmatpush3.bf16.msra.mxu1 %v865_v15  ;;  %v893_v52 = vld [vmem:[%s1150_s1 + $0x110] sm:$0xff]   ;;  %v27_v54 = vld [vmem:[%s1149_s0 + $0x28] sm:$0xff] }
  0x12   :  { %786 = vmatprep.subr.bf16.mxu1 %v868_v18  ;;  %v894_v55 = vld [vmem:[%s1150_s1 + $0x148] sm:$0xff]   ;;  %v34_v56 = vpack.c.bf16 %v27_v54, %v27_v54  ;;  %v28_v57 = vld [vmem:[%s1149_s0 + $0x30] sm:$0xff] }
  0x13   :  { %765 = vmatpush3.bf16.msra.mxu0 %v867_v17  ;;  %v35_v58 = vpack.c.bf16 %v28_v57, %v28_v57 }
  0x14   :  { %766 = vmatprep.subr.bf16.mxu0 %v870_v20 }
  0x15   :  { %787 = vmatpush3.bf16.msra.mxu1 %v869_v19 }
  0x16   :  { %788 = vmatprep.subr.bf16.mxu1 %v872_v22 }
  0x17   :  { %767 = vmatpush3.bf16.msra.mxu0 %v871_v21 }
  0x18   :  { %768 = vmatprep.subr.bf16.mxu0 %v874_v24 }
  0x19   :  { %789 = vmatpush3.bf16.msra.mxu1 %v873_v23 }
  0x1a   :  { %790 = vmatprep.subr.bf16.mxu1 %v876_v26 }
  0x1b   :  { %769 = vmatpush3.bf16.msra.mxu0 %v875_v25 }
  0x1c   :  { %770 = vmatprep.subr.bf16.mxu0 %v878_v28 }
  0x1d   :  { %791 = vmatpush3.bf16.msra.mxu1 %v877_v27 }
  0x1e   :  { %792 = vmatprep.subr.bf16.mxu1 %v880_v30 }
  0x1f   :  { %771 = vmatpush3.bf16.msra.mxu0 %v879_v29 }
  0x20   :  { %800 = vmatprep.subr.bf16.mxu0 %v882_v36 }
  0x21   :  { %793 = vmatpush3.bf16.msra.mxu1 %v881_v33 }
  0x22   :  { %472 = vmatmul.mubr.bf16.vlgmr.msra.gmra.mxu0 %v29_v35  ;;  %829 = vmatprep.subr.bf16.mxu1 %v925_v44 }
  0x23   :  { %801 = vmatpush3.bf16.msra.mxu0 %v883_v39  ;;  %551 = vmatprep.mubr.bf16.mxu0 %v34_v56 }
  0x24   :  { %512 = vmatmul.mubr.bf16.vlgmr.msra.gmra.mxu1 %v31_v41  ;;  %802 = vmatprep.subr.bf16.mxu0 %v884_v42 }
  0x25   :  { %831 = vmatprep.mubr.msk.bf16.mxu1 %vm926_vm0, %v925_v44  ;;  %830 = vmatpush3.bf16.msra.mxu1 %v898_v53 }
  0x26   :  { %835 = vmatprep.subr.bf16.mxu1 %v925_v44 }
  0x27   :  { %803 = vmatpush3.bf16.msra.mxu0 %v885_v43 }
  0x28   :  { %804 = vmatprep.subr.bf16.mxu0 %v886_v45 }
  0x2b   :  { %805 = vmatpush3.bf16.msra.mxu0 %v887_v46 }
  0x2c   :  { %806 = vmatprep.subr.bf16.mxu0 %v888_v47 }
  0x2f   :  { %807 = vmatpush3.bf16.msra.mxu0 %v889_v48 }
  0x30   :  { %808 = vmatprep.subr.bf16.mxu0 %v890_v49 }
  0x33   :  { %809 = vmatpush3.bf16.msra.mxu0 %v891_v50 }
  0x34   :  { %810 = vmatprep.subr.bf16.mxu0 %v892_v51 }
  0x35   :  { %10 = vsyncpa [#allocation3], 0  ;;  %832 = vmatmul.mubr.msk.bf16.vlgmr.msra.gmra.mxu1 %vm435_vm1, %v35_v58  ;;  %v895_v59 = vld [vmem:[%s1150_s1 + $0x108] sm:$0xff]   ;;  %v896_v60 = vld [vmem:[%s1150_s1 + $0x140] sm:$0xff]   ;;  %vm640_vm2 = vcmask 523264   ;;  %s927_s14 = smov [#allocation2]  }
  0x36   :  { %843 = vmatprep.mubr.msk.bf16.mxu1 %vm926_vm0, %v925_v44  ;;  %v897_v61 = vld [vmem:[%s1150_s1 + $0x100] sm:$0xff]   ;;  %v899_v0 = vld [vmem:[%s1152_s3 + $0x18] sm:$0xff]   ;;  %v900_v1 = vld [vmem:[%s1152_s3 + $0x10] sm:$0xff]  }
  0x37   :  { %811 = vmatpush3.bf16.msra.mxu0 %v893_v52  ;;  %v26_v62 = vld [vmem:[%s1149_s0 + $0x20] sm:$0xff]  ;;  %836 = vmatpush3.bf16.msra.mxu1 %v899_v0  ;;  %v901_v2 = vld [vmem:[%s1152_s3 + $0x8] sm:$0xff]  }
  0x38   :  { %812 = vmatprep.subr.bf16.mxu0 %v894_v55  ;;  %v33_v63 = vpack.c.bf16 %v26_v62, %v26_v62  ;;  %837 = vmatprep.subr.bf16.mxu1 %v925_v44  ;;  %v902_v3 = vld [vmem:[%s1152_s3] sm:$0xff]  }
  0x39   :  { %v699_v17 = vld [vmem:[%s1151_s2] ss:$0 sm:$0xff]  ;;  %s691_s2 = sshll.u32 %s927_s14, 4  ;;  %s692_s2 = int_to_ptr.vmem [resolvable:$true] %s691_s2 }
  0x3a   :  { %v750_v30 = vld [vmem:[%s1153_s4] ss:$0 sm:$0xff]  ;;  %s903_s15 = scalar_lea.vmem %s692_s2, 128  ;;  %p908_p1 = scmp.lt.s32.totalorder %s692_s2, %s692_s2 }
  0x3b   :  { %813 = vmatpush3.bf16.msra.mxu0 %v895_v59  ;;  %838 = vmatpush3.bf16.msra.mxu1 %v900_v1  ;;  %p904_p0 = scmp.ne.s32.totalorder %s692_s2, %s903_s15  ;;  %p909_p2 = scmp.lt.s32.totalorder %s903_s15, %s903_s15 }
  0x3c   :  { %814 = vmatprep.subr.bf16.mxu0 %v896_v60  ;;  %839 = vmatprep.subr.bf16.mxu1 %v925_v44 }
  0x3d   :  { %p910_p3 = por %p909_p2, %p908_p1 }
  0x3f   :  { %815 = vmatpush3.bf16.msra.mxu0 %v897_v61  ;;  %840 = vmatpush3.bf16.msra.mxu1 %v901_v2  ;;  %p911_p4 = pnand %p910_p3, %p904_p0 }
  0x40   :  { %841 = vmatprep.subr.bf16.mxu1 %v925_v44 }
  0x42   :  { %552 = vmatmul.mubr.bf16.vlgmr.msra.gmra.mxu0 %v33_v63 }
  0x43   :  { %842 = vmatpush3.bf16.msra.mxu1 %v902_v3 }
  0xe2   :  { %v772_v4 = vpop.f32.mrf.mxu0 }
  0xe4   :  { %v773_v5 = vpop.f32.mrf.mxu0  ;;  %v794_v6 = vpop.f32.mrf.mxu1 }
  0xe5   :  { %v774_v16 = vadd.f32 %v773_v5, %v772_v4 }
  0xe6   :  { %v775_v7 = vpop.f32.mrf.mxu0  ;;  %v795_v8 = vpop.f32.mrf.mxu1 }
  0xe7   :  { %v474_v18 = vadd.f32 %v774_v16, %v699_v17  ;;  %v796_v19 = vadd.f32 %v795_v8, %v794_v6 }
  0xe8   :  { %v776_v9 = vpop.f32.mrf.mxu0  ;;  %v797_v10 = vpop.f32.mrf.mxu1 }
  0xe9   :  { %v514_v22 = vadd.f32 %v796_v19, %v474_v18 }
  0xea   :  { %v798_v11 = vpop.f32.mrf.mxu1 }
  0xf5   :  { %v593_v12 = vpop.f32.mrf.mxu1 }
  0xf7   :  { %v833_v13 = vpop.f32.mrf.mxu1 }
  0xf9   :  { %v596_v14 = vpop.f32.mrf.mxu1 }
  0xfb   :  { %v834_v15 = vpop.f32.mrf.mxu1 }
 0x102   :  { %v816_v20 = vpop.f32.mrf.mxu0 }
 0x104   :  { %v817_v21 = vpop.f32.mrf.mxu0 }
 0x105   :  { %v818_v23 = vadd.f32 %v817_v21, %v816_v20 }
 0x106   :  { %v819_v24 = vpop.f32.mrf.mxu0 }
 0x107   :  { %v554_v25 = vadd.f32 %v818_v23, %v514_v22 }
 0x108   :  { %v820_v26 = vpop.f32.mrf.mxu0 }
 0x109   :  { %v594_v27 = vadd.f32 %v593_v12, %v554_v25 }
 0x10b   :  { %v599_v28 = vmax.f32 %v594_v27, 0.0 }
 0x10d   :  { %v600_v29 = vpack.c.bf16 %v599_v28, %v599_v28 }
 0x10f   :  { %844 = vmatmul.mubr.msk.bf16.vlgmr.msra.gmra.mxu1 %vm640_vm2, %v600_v29 }
 0x1cf   :  { %v678_v31 = vpop.f32.mrf.mxu1 }
 0x1d0   :  { %v679_v32 = vadd.f32 %v750_v30, %v678_v31 }
 0x1d1   :  { %v845_v33 = vpop.f32.mrf.mxu1 }
 0x1d2   :  { %684 = vst [vmem:[#allocation2] sm:$0xff] %v679_v32 }
 0x1d3   :  { %v681_v34 = vpop.f32.mrf.mxu1 }
 0x1d4   :  { %914 = shalt.err (!%p911_p4)
}
 0x1d5   :  { %694 = dma.vmem_to_hbm [thread:$0]  %s692_s2, 128, %s1154_s5, [#allocation3]   ;;  %v846_v35 = vpop.f32.mrf.mxu1 }
 0x1d6   :  { %923 = dma.done.wait [#allocation3], 128  }
 0x1d7   :  { %924 = vsyncadd [#allocation3], 4294967168 }
 0x1d8   :  { %698 = vsyncpa [#allocation3], 1 }

</bundles_post_ra>
